<compile_context>
chip_gen: v7x
topology: tpu7x:2x2x1
jax: 0.10.0
libtpu: 0.0.40
codegen_flags: <defaults>
</compile_context>

<pallas_src>
import functools

import jax
import jax.numpy as jnp
from jax import lax
from jax.experimental import pallas as pl
from jax.experimental.pallas import tpu as pltpu


def last2d_kernel(x_ref, w1_ref, b1_ref, w2_ref, b2_ref, w3_ref, b3_ref,
                  masks_ref, out_ref, *, W, HW, softmax, mm_dtype):
    x = x_ref[0]                      # (Cin_p, HW) f32, lane-dense
    masks = masks_ref[...]            # (9, HW)   f32 combined row+col validity
    w1 = w1_ref[...]                  # (Cmid_p, 9*Cin_p)  mm_dtype (BN folded)
    b1 = b1_ref[...]                  # (Cmid_p, HW)       f32 (pre-broadcast)
    w2 = w2_ref[...]                  # (Cmid_p, 9*Cmid_p) mm_dtype
    b2 = b2_ref[...]                  # (Cmid_p, HW)       f32
    w3 = w3_ref[...]                  # (Cout, Cmid_p)     mm_dtype
    b3 = b3_ref[...]                  # (Cout, HW)         f32

    def stacked_taps(a):
        """a: (C, HW) f32  ->  (9*C, HW) mm_dtype stacked rolled+masked taps."""
        chunks = []
        t = 0
        for oy in (-1, 0, 1):
            for ox in (-1, 0, 1):
                d = oy * W + ox
                if d == 0:
                    v = a                                   # center tap: no roll, all-valid
                else:
                    v = pltpu.roll(a, shift=(-d) % HW, axis=1)   # static XLU lane roll
                    v = v * masks[t:t + 1, :]               # zero row/col wrap taps (VPU)
                chunks.append(v)
                t += 1
        # C is padded to a multiple of 8 in the wrapper -> tile-aligned concat,
        # then one bulk cast to the MXU operand dtype.
        return jnp.concatenate(chunks, axis=0).astype(mm_dtype)

    # Conv1 (+ folded BN1) + ReLU : one MXU matmul, contraction 9*Cin_p.
    s1 = stacked_taps(x)
    y1 = jnp.dot(w1, s1, preferred_element_type=jnp.float32)
    y1 = jnp.maximum(y1 + b1, 0.0)

    # Conv2 (+ folded BN2) + ReLU : one MXU matmul, contraction 9*Cmid_p.
    s2 = stacked_taps(y1)
    y2 = jnp.dot(w2, s2, preferred_element_type=jnp.float32)
    y2 = jnp.maximum(y2 + b2, 0.0)

    # 1x1 conv as a single dot (no serial VPU accumulator chain).
    y3 = jnp.dot(w3, y2.astype(mm_dtype), preferred_element_type=jnp.float32) + b3

    if softmax:
        # nn.Softmax(dim=1): channel axis == sublane axis in this layout.
        m = jnp.max(y3, axis=0, keepdims=True)              # (1, HW)
        e = jnp.exp(y3 - m)
        den = jnp.sum(e, axis=0, keepdims=True)             # (1, HW)
        r = pl.reciprocal(den, approx=True)                 # EUP slot
        r = r * (2.0 - den * r)                             # 1 Newton step -> ~f32
        y3 = e * r

    out_ref[0] = y3.astype(out_ref.dtype)                   # lane-dense store


def _round_up8(c):
    return (c + 7) // 8 * 8


@functools.partial(jax.jit, static_argnames=("softmax", "mm_dtype"))
def last2d_forward(x_nchw, params, softmax=False, mm_dtype="bfloat16"):
    mmd = {"bfloat16": jnp.bfloat16, "float32": jnp.float32}[mm_dtype]

    N, Cin, H, W = x_nchw.shape
    Cmid = params["w1"].shape[0]                 # torch layout: (Cout, Cin, kH, kW)
    Cout = params["w3"].shape[0]
    HW = H * W
    eps = 1e-5

    Cin_p = _round_up8(Cin)                      # pad channels to multiples of 8 so the
    Cmid_p = _round_up8(Cmid)                    # per-tap stacking is sublane-tile aligned

    # Flattened NCHW: pure reshape, H*W on the lane axis; zero-pad input channels.
    x = x_nchw.reshape(N, Cin, HW).astype(jnp.float32)
    if Cin_p != Cin:
        x = jnp.pad(x, ((0, 0), (0, Cin_p - Cin), (0, 0)))

    def fold(w, b, gamma, beta, mean, var, ci_p, co_p):
        """Fold inference BN into the conv; stack taps: (Co,Ci,3,3)->(Co_p, 9*Ci_p)."""
        co, ci = w.shape[0], w.shape[1]
        s = gamma / jnp.sqrt(var + eps)
        wt = jnp.transpose(w, (2, 3, 0, 1)).reshape(9, co, ci) * s[None, :, None]
        wt = jnp.pad(wt, ((0, 0), (0, co_p - co), (0, ci_p - ci)))   # (9, Co_p, Ci_p)
        w_stk = jnp.transpose(wt, (1, 0, 2)).reshape(co_p, 9 * ci_p)  # tap-major columns
        bias = jnp.pad(beta + (b - mean) * s, (0, co_p - co))
        bias_b = jnp.broadcast_to(bias[:, None], (co_p, HW))
        return w_stk.astype(mmd), bias_b.astype(jnp.float32)

    w1s, b1b = fold(params["w1"], params["b1"], params["g1"], params["be1"],
                    params["m1"], params["v1"], Cin_p, Cmid_p)
    w2s, b2b = fold(params["w2"], params["b2"], params["g2"], params["be2"],
                    params["m2"], params["v2"], Cmid_p, Cmid_p)
    w3 = jnp.pad(params["w3"][:, :, 0, 0], ((0, 0), (0, Cmid_p - Cmid))).astype(mmd)
    b3b = jnp.broadcast_to(params["b3"][:, None], (Cout, HW)).astype(jnp.float32)

    # Combined row+column validity mask per tap (tap order (dy, dx) row-major,
    # matching the weight stacking above).  Zeroes every roll-wrap contribution.
    p = jnp.arange(HW, dtype=jnp.int32)
    yy, xx = p // W, p % W
    rows = []
    for oy in (-1, 0, 1):
        for ox in (-1, 0, 1):
            rows.append((yy + oy >= 0) & (yy + oy < H) & (xx + ox >= 0) & (xx + ox < W))
    masks = jnp.stack(rows).astype(jnp.float32)              # (9, HW)

    kernel = functools.partial(last2d_kernel, W=W, HW=HW,
                               softmax=softmax, mm_dtype=mmd)

    out = pl.pallas_call(
        kernel,
        out_shape=jax.ShapeDtypeStruct((N, Cout, HW), jnp.float32),
        grid=(N,),                                            # batch-parallel: uses both
        in_specs=[                                            # v7x TensorCores
            pl.BlockSpec((1, Cin_p, HW), lambda b: (b, 0, 0)),
            pl.BlockSpec((Cmid_p, 9 * Cin_p), lambda b: (0, 0)),
            pl.BlockSpec((Cmid_p, HW), lambda b: (0, 0)),
            pl.BlockSpec((Cmid_p, 9 * Cmid_p), lambda b: (0, 0)),
            pl.BlockSpec((Cmid_p, HW), lambda b: (0, 0)),
            pl.BlockSpec((Cout, Cmid_p), lambda b: (0, 0)),
            pl.BlockSpec((Cout, HW), lambda b: (0, 0)),
            pl.BlockSpec((9, HW), lambda b: (0, 0)),
        ],
        out_specs=pl.BlockSpec((1, Cout, HW), lambda b: (b, 0, 0)),
        compiler_params=pltpu.CompilerParams(dimension_semantics=("parallel",)),
    )(x, w1s, b1b, w2s, b2b, w3, b3b, masks)

    # Output already in flattened NCHW order: reshape only, no transpose.
    return out.reshape(N, Cout, H, W)


# ----------------------------- pure-JAX reference -----------------------------
def ref_forward(x, params, softmax=False):
    eps = 1e-5

    def conv(x, w, b, pad):
        y = lax.conv_general_dilated(
            x, w, (1, 1), [(pad, pad), (pad, pad)],
            dimension_numbers=("NCHW", "OIHW", "NCHW"))
        return y + b[None, :, None, None]

    def bn(x, g, be, m, v):
        return ((x - m[None, :, None, None]) / jnp.sqrt(v[None, :, None, None] + eps)
                * g[None, :, None, None] + be[None, :, None, None])

    h = jax.nn.relu(bn(conv(x, params["w1"], params["b1"], 1),
                       params["g1"], params["be1"], params["m1"], params["v1"]))
    h = jax.nn.relu(bn(conv(h, params["w2"], params["b2"], 1),
                       params["g2"], params["be2"], params["m2"], params["v2"]))
    y = conv(h, params["w3"], params["b3"], 0)
    if softmax:
        y = jax.nn.softmax(y, axis=1)
    return y


def init_params(key, in_channels, middle_channels, out_channels):
    ks = jax.random.split(key, 14)
    f32 = jnp.float32
    return {
        "w1": 0.1 * jax.random.normal(ks[0], (middle_channels, in_channels, 3, 3), f32),
        "b1": 0.05 * jax.random.normal(ks[1], (middle_channels,), f32),
        "g1": 1.0 + 0.1 * jax.random.normal(ks[2], (middle_channels,), f32),
        "be1": 0.1 * jax.random.normal(ks[3], (middle_channels,), f32),
        "m1": 0.05 * jax.random.normal(ks[4], (middle_channels,), f32),
        "v1": 0.5 + jnp.abs(jax.random.normal(ks[5], (middle_channels,), f32)),
        "w2": 0.1 * jax.random.normal(ks[6], (middle_channels, middle_channels, 3, 3), f32),
        "b2": 0.05 * jax.random.normal(ks[7], (middle_channels,), f32),
        "g2": 1.0 + 0.1 * jax.random.normal(ks[8], (middle_channels,), f32),
        "be2": 0.1 * jax.random.normal(ks[9], (middle_channels,), f32),
        "m2": 0.05 * jax.random.normal(ks[10], (middle_channels,), f32),
        "v2": 0.5 + jnp.abs(jax.random.normal(ks[11], (middle_channels,), f32)),
        "w3": 0.1 * jax.random.normal(ks[12], (out_channels, middle_channels, 1, 1), f32),
        "b3": 0.05 * jax.random.normal(ks[13], (out_channels,), f32),
    }


if __name__ == "__main__":
    key = jax.random.PRNGKey(0)
    k_x, k_p = jax.random.split(key)

    N, Cin, H, W = 2, 4, 16, 16
    Cmid, Cout = 8, 3

    x = jax.random.normal(k_x, (N, Cin, H, W), jnp.float32)
    params = init_params(k_p, Cin, Cmid, Cout)

    # f32 MXU-operand path: tight tolerance.  bf16 path (v6e/v7x-native): loose
    # tolerance as flagged in the perf review.
    tol = {"float32": dict(rtol=5e-4, atol=5e-5),
           "bfloat16": dict(rtol=5e-2, atol=5e-2)}

    for mm_dtype in ("float32", "bfloat16"):
        for use_softmax in (False, True):
            out = jax.block_until_ready(
                last2d_forward(x, params, softmax=use_softmax, mm_dtype=mm_dtype))
            ref = jax.block_until_ready(ref_forward(x, params, softmax=use_softmax))
            assert out.shape == (N, Cout, H, W), out.shape
            max_err = float(jnp.max(jnp.abs(out - ref)))
            assert jnp.allclose(out, ref, **tol[mm_dtype]), (mm_dtype, use_softmax, max_err)

    print("KERNEL_OK")
</pallas_src>

<mosaic_0001>
module attributes {stable_mosaic.version = 11 : i64} {
  func.func @last2d_kernel(%arg0: i32, %arg1: memref<1x8x256xf32, #tpu.memory_space<vmem>>, %arg2: memref<8x72xf32, #tpu.memory_space<vmem>>, %arg3: memref<8x256xf32, #tpu.memory_space<vmem>>, %arg4: memref<8x72xf32, #tpu.memory_space<vmem>>, %arg5: memref<8x256xf32, #tpu.memory_space<vmem>>, %arg6: memref<3x8xf32, #tpu.memory_space<vmem>>, %arg7: memref<3x256xf32, #tpu.memory_space<vmem>>, %arg8: memref<9x256xf32, #tpu.memory_space<vmem>>, %arg9: memref<1x3x256xf32, #tpu.memory_space<vmem>>) attributes {dimension_semantics = [#tpu.dimension_semantics<parallel>], iteration_bounds = array<i64: 2>, scalar_prefetch = 0 : i64, scratch_operands = 0 : i64, tpu.core_type = #tpu.core_type<tc>, window_params = [{transform_indices = @transform_0, window_bounds = array<i64: 1, 8, 256>}, {pipeline_mode = #tpu.pipeline_mode<synchronous>, transform_indices = @transform_1, window_bounds = array<i64: 8, 72>}, {pipeline_mode = #tpu.pipeline_mode<synchronous>, transform_indices = @transform_2, window_bounds = array<i64: 8, 256>}, {pipeline_mode = #tpu.pipeline_mode<synchronous>, transform_indices = @transform_3, window_bounds = array<i64: 8, 72>}, {pipeline_mode = #tpu.pipeline_mode<synchronous>, transform_indices = @transform_4, window_bounds = array<i64: 8, 256>}, {pipeline_mode = #tpu.pipeline_mode<synchronous>, transform_indices = @transform_5, window_bounds = array<i64: 3, 8>}, {pipeline_mode = #tpu.pipeline_mode<synchronous>, transform_indices = @transform_6, window_bounds = array<i64: 3, 256>}, {pipeline_mode = #tpu.pipeline_mode<synchronous>, transform_indices = @transform_7, window_bounds = array<i64: 9, 256>}, {transform_indices = @transform_8, window_bounds = array<i64: 1, 3, 256>}]} {
    %c0 = arith.constant 0 : index
    %c0_0 = arith.constant 0 : index
    %c0_1 = arith.constant 0 : index
    %0 = vector.load %arg1[%c0, %c0_0, %c0_1] : memref<1x8x256xf32, #tpu.memory_space<vmem>>, vector<1x8x256xf32>
    %1 = vector.shape_cast %0 : vector<1x8x256xf32> to vector<8x256xf32>
    %c0_2 = arith.constant 0 : index
    %c0_3 = arith.constant 0 : index
    %2 = vector.load %arg8[%c0_2, %c0_3] : memref<9x256xf32, #tpu.memory_space<vmem>>, vector<9x256xf32>
    %c0_4 = arith.constant 0 : index
    %c0_5 = arith.constant 0 : index
    %3 = vector.load %arg2[%c0_4, %c0_5] : memref<8x72xf32, #tpu.memory_space<vmem>>, vector<8x72xf32>
    %c0_6 = arith.constant 0 : index
    %c0_7 = arith.constant 0 : index
    %4 = vector.load %arg3[%c0_6, %c0_7] : memref<8x256xf32, #tpu.memory_space<vmem>>, vector<8x256xf32>
    %c0_8 = arith.constant 0 : index
    %c0_9 = arith.constant 0 : index
    %5 = vector.load %arg4[%c0_8, %c0_9] : memref<8x72xf32, #tpu.memory_space<vmem>>, vector<8x72xf32>
    %c0_10 = arith.constant 0 : index
    %c0_11 = arith.constant 0 : index
    %6 = vector.load %arg5[%c0_10, %c0_11] : memref<8x256xf32, #tpu.memory_space<vmem>>, vector<8x256xf32>
    %c0_12 = arith.constant 0 : index
    %c0_13 = arith.constant 0 : index
    %7 = vector.load %arg6[%c0_12, %c0_13] : memref<3x8xf32, #tpu.memory_space<vmem>>, vector<3x8xf32>
    %c0_14 = arith.constant 0 : index
    %c0_15 = arith.constant 0 : index
    %8 = vector.load %arg7[%c0_14, %c0_15] : memref<3x256xf32, #tpu.memory_space<vmem>>, vector<3x256xf32>
    %c17_i32 = arith.constant 17 : i32
    %9 = tpu.dynamic_rotate %1 by %c17_i32 dim 1 : vector<8x256xf32>, i32 -> vector<8x256xf32>
    %10 = vector.extract_strided_slice %2 {offsets = [0, 0], sizes = [1, 256], strides = [1, 1]} : vector<9x256xf32> to vector<1x256xf32>
    %11 = vector.broadcast %10 : vector<1x256xf32> to vector<8x256xf32>
    %12 = arith.mulf %9, %11 : vector<8x256xf32>
    %c16_i32 = arith.constant 16 : i32
    %13 = tpu.dynamic_rotate %1 by %c16_i32 dim 1 : vector<8x256xf32>, i32 -> vector<8x256xf32>
    %14 = vector.extract_strided_slice %2 {offsets = [1, 0], sizes = [1, 256], strides = [1, 1]} : vector<9x256xf32> to vector<1x256xf32>
    %15 = vector.broadcast %14 : vector<1x256xf32> to vector<8x256xf32>
    %16 = arith.mulf %13, %15 : vector<8x256xf32>
    %c15_i32 = arith.constant 15 : i32
    %17 = tpu.dynamic_rotate %1 by %c15_i32 dim 1 : vector<8x256xf32>, i32 -> vector<8x256xf32>
    %18 = vector.extract_strided_slice %2 {offsets = [2, 0], sizes = [1, 256], strides = [1, 1]} : vector<9x256xf32> to vector<1x256xf32>
    %19 = vector.broadcast %18 : vector<1x256xf32> to vector<8x256xf32>
    %20 = arith.mulf %17, %19 : vector<8x256xf32>
    %c1_i32 = arith.constant 1 : i32
    %21 = tpu.dynamic_rotate %1 by %c1_i32 dim 1 : vector<8x256xf32>, i32 -> vector<8x256xf32>
    %22 = vector.extract_strided_slice %2 {offsets = [3, 0], sizes = [1, 256], strides = [1, 1]} : vector<9x256xf32> to vector<1x256xf32>
    %23 = vector.broadcast %22 : vector<1x256xf32> to vector<8x256xf32>
    %24 = arith.mulf %21, %23 : vector<8x256xf32>
    %c255_i32 = arith.constant 255 : i32
    %25 = tpu.dynamic_rotate %1 by %c255_i32 dim 1 : vector<8x256xf32>, i32 -> vector<8x256xf32>
    %26 = vector.extract_strided_slice %2 {offsets = [5, 0], sizes = [1, 256], strides = [1, 1]} : vector<9x256xf32> to vector<1x256xf32>
    %27 = vector.broadcast %26 : vector<1x256xf32> to vector<8x256xf32>
    %28 = arith.mulf %25, %27 : vector<8x256xf32>
    %c241_i32 = arith.constant 241 : i32
    %29 = tpu.dynamic_rotate %1 by %c241_i32 dim 1 : vector<8x256xf32>, i32 -> vector<8x256xf32>
    %30 = vector.extract_strided_slice %2 {offsets = [6, 0], sizes = [1, 256], strides = [1, 1]} : vector<9x256xf32> to vector<1x256xf32>
    %31 = vector.broadcast %30 : vector<1x256xf32> to vector<8x256xf32>
    %32 = arith.mulf %29, %31 : vector<8x256xf32>
    %c240_i32 = arith.constant 240 : i32
    %33 = tpu.dynamic_rotate %1 by %c240_i32 dim 1 : vector<8x256xf32>, i32 -> vector<8x256xf32>
    %34 = vector.extract_strided_slice %2 {offsets = [7, 0], sizes = [1, 256], strides = [1, 1]} : vector<9x256xf32> to vector<1x256xf32>
    %35 = vector.broadcast %34 : vector<1x256xf32> to vector<8x256xf32>
    %36 = arith.mulf %33, %35 : vector<8x256xf32>
    %c239_i32 = arith.constant 239 : i32
    %37 = tpu.dynamic_rotate %1 by %c239_i32 dim 1 : vector<8x256xf32>, i32 -> vector<8x256xf32>
    %38 = vector.extract_strided_slice %2 {offsets = [8, 0], sizes = [1, 256], strides = [1, 1]} : vector<9x256xf32> to vector<1x256xf32>
    %39 = vector.broadcast %38 : vector<1x256xf32> to vector<8x256xf32>
    %40 = arith.mulf %37, %39 : vector<8x256xf32>
    %41 = tpu.concatenate %12, %16, %20, %24, %1, %28, %32, %36, %40 in 0 : vector<8x256xf32>, vector<8x256xf32>, vector<8x256xf32>, vector<8x256xf32>, vector<8x256xf32>, vector<8x256xf32>, vector<8x256xf32>, vector<8x256xf32>, vector<8x256xf32> -> vector<72x256xf32>
    %cst = arith.constant dense<0.000000e+00> : vector<8x256xf32>
    %42 = tpu.matmul %3, %41, %cst {dimension_numbers = #tpu.dot_dimension_numbers<[1], [0], [0], [1], [0, 0, 1, 1], [], []>} : vector<8x72xf32>, vector<72x256xf32>, vector<8x256xf32> -> vector<8x256xf32>
    %43 = arith.addf %42, %4 : vector<8x256xf32>
    %cst_16 = arith.constant 0.000000e+00 : f32
    %44 = vector.broadcast %cst_16 : f32 to vector<8x256xf32>
    %45 = arith.maximumf %43, %44 : vector<8x256xf32>
    %c17_i32_17 = arith.constant 17 : i32
    %46 = tpu.dynamic_rotate %45 by %c17_i32_17 dim 1 : vector<8x256xf32>, i32 -> vector<8x256xf32>
    %47 = vector.extract_strided_slice %2 {offsets = [0, 0], sizes = [1, 256], strides = [1, 1]} : vector<9x256xf32> to vector<1x256xf32>
    %48 = vector.broadcast %47 : vector<1x256xf32> to vector<8x256xf32>
    %49 = arith.mulf %46, %48 : vector<8x256xf32>
    %c16_i32_18 = arith.constant 16 : i32
    %50 = tpu.dynamic_rotate %45 by %c16_i32_18 dim 1 : vector<8x256xf32>, i32 -> vector<8x256xf32>
    %51 = vector.extract_strided_slice %2 {offsets = [1, 0], sizes = [1, 256], strides = [1, 1]} : vector<9x256xf32> to vector<1x256xf32>
    %52 = vector.broadcast %51 : vector<1x256xf32> to vector<8x256xf32>
    %53 = arith.mulf %50, %52 : vector<8x256xf32>
    %c15_i32_19 = arith.constant 15 : i32
    %54 = tpu.dynamic_rotate %45 by %c15_i32_19 dim 1 : vector<8x256xf32>, i32 -> vector<8x256xf32>
    %55 = vector.extract_strided_slice %2 {offsets = [2, 0], sizes = [1, 256], strides = [1, 1]} : vector<9x256xf32> to vector<1x256xf32>
    %56 = vector.broadcast %55 : vector<1x256xf32> to vector<8x256xf32>
    %57 = arith.mulf %54, %56 : vector<8x256xf32>
    %c1_i32_20 = arith.constant 1 : i32
    %58 = tpu.dynamic_rotate %45 by %c1_i32_20 dim 1 : vector<8x256xf32>, i32 -> vector<8x256xf32>
    %59 = vector.extract_strided_slice %2 {offsets = [3, 0], sizes = [1, 256], strides = [1, 1]} : vector<9x256xf32> to vector<1x256xf32>
    %60 = vector.broadcast %59 : vector<1x256xf32> to vector<8x256xf32>
    %61 = arith.mulf %58, %60 : vector<8x256xf32>
    %c255_i32_21 = arith.constant 255 : i32
    %62 = tpu.dynamic_rotate %45 by %c255_i32_21 dim 1 : vector<8x256xf32>, i32 -> vector<8x256xf32>
    %63 = vector.extract_strided_slice %2 {offsets = [5, 0], sizes = [1, 256], strides = [1, 1]} : vector<9x256xf32> to vector<1x256xf32>
    %64 = vector.broadcast %63 : vector<1x256xf32> to vector<8x256xf32>
    %65 = arith.mulf %62, %64 : vector<8x256xf32>
    %c241_i32_22 = arith.constant 241 : i32
    %66 = tpu.dynamic_rotate %45 by %c241_i32_22 dim 1 : vector<8x256xf32>, i32 -> vector<8x256xf32>
    %67 = vector.extract_strided_slice %2 {offsets = [6, 0], sizes = [1, 256], strides = [1, 1]} : vector<9x256xf32> to vector<1x256xf32>
    %68 = vector.broadcast %67 : vector<1x256xf32> to vector<8x256xf32>
    %69 = arith.mulf %66, %68 : vector<8x256xf32>
    %c240_i32_23 = arith.constant 240 : i32
    %70 = tpu.dynamic_rotate %45 by %c240_i32_23 dim 1 : vector<8x256xf32>, i32 -> vector<8x256xf32>
    %71 = vector.extract_strided_slice %2 {offsets = [7, 0], sizes = [1, 256], strides = [1, 1]} : vector<9x256xf32> to vector<1x256xf32>
    %72 = vector.broadcast %71 : vector<1x256xf32> to vector<8x256xf32>
    %73 = arith.mulf %70, %72 : vector<8x256xf32>
    %c239_i32_24 = arith.constant 239 : i32
    %74 = tpu.dynamic_rotate %45 by %c239_i32_24 dim 1 : vector<8x256xf32>, i32 -> vector<8x256xf32>
    %75 = vector.extract_strided_slice %2 {offsets = [8, 0], sizes = [1, 256], strides = [1, 1]} : vector<9x256xf32> to vector<1x256xf32>
    %76 = vector.broadcast %75 : vector<1x256xf32> to vector<8x256xf32>
    %77 = arith.mulf %74, %76 : vector<8x256xf32>
    %78 = tpu.concatenate %49, %53, %57, %61, %45, %65, %69, %73, %77 in 0 : vector<8x256xf32>, vector<8x256xf32>, vector<8x256xf32>, vector<8x256xf32>, vector<8x256xf32>, vector<8x256xf32>, vector<8x256xf32>, vector<8x256xf32>, vector<8x256xf32> -> vector<72x256xf32>
    %cst_25 = arith.constant dense<0.000000e+00> : vector<8x256xf32>
    %79 = tpu.matmul %5, %78, %cst_25 {dimension_numbers = #tpu.dot_dimension_numbers<[1], [0], [0], [1], [0, 0, 1, 1], [], []>} : vector<8x72xf32>, vector<72x256xf32>, vector<8x256xf32> -> vector<8x256xf32>
    %80 = arith.addf %79, %6 : vector<8x256xf32>
    %cst_26 = arith.constant 0.000000e+00 : f32
    %81 = vector.broadcast %cst_26 : f32 to vector<8x256xf32>
    %82 = arith.maximumf %80, %81 : vector<8x256xf32>
    %cst_27 = arith.constant dense<0.000000e+00> : vector<3x256xf32>
    %83 = tpu.matmul %7, %82, %cst_27 {dimension_numbers = #tpu.dot_dimension_numbers<[1], [0], [0], [1], [0, 0, 1, 1], [], []>} : vector<3x8xf32>, vector<8x256xf32>, vector<3x256xf32> -> vector<3x256xf32>
    %84 = arith.addf %83, %8 : vector<3x256xf32>
    %c0_28 = arith.constant 0 : index
    %c0_29 = arith.constant 0 : index
    %c0_30 = arith.constant 0 : index
    %85 = vector.load %arg9[%c0_28, %c0_29, %c0_30] : memref<1x3x256xf32, #tpu.memory_space<vmem>>, vector<1x3x256xf32>
    %86 = vector.shape_cast %85 : vector<1x3x256xf32> to vector<3x256xf32>
    %87 = vector.shape_cast %84 : vector<3x256xf32> to vector<1x3x256xf32>
    tpu.vector_store %arg9[%c0_28, %c0_29, %c0_30], %87 {strides = array<i32>} : memref<1x3x256xf32, #tpu.memory_space<vmem>>, vector<1x3x256xf32>,
    return
  }
  func.func @transform_0(%arg0: i32) -> (i32, i32, i32) {
    %c0_i32 = arith.constant 0 : i32
    %c0_i32_0 = arith.constant 0 : i32
    %c0_i32_1 = arith.constant 0 : i32
    return %arg0, %c0_i32, %c0_i32_0 : i32, i32, i32
  }
  func.func @transform_1(%arg0: i32) -> (i32, i32) {
    %c0_i32 = arith.constant 0 : i32
    %c0_i32_0 = arith.constant 0 : i32
    %c0_i32_1 = arith.constant 0 : i32
    return %c0_i32, %c0_i32_0 : i32, i32
  }
  func.func @transform_2(%arg0: i32) -> (i32, i32) {
    %c0_i32 = arith.constant 0 : i32
    %c0_i32_0 = arith.constant 0 : i32
    %c0_i32_1 = arith.constant 0 : i32
    return %c0_i32, %c0_i32_0 : i32, i32
  }
  func.func @transform_3(%arg0: i32) -> (i32, i32) {
    %c0_i32 = arith.constant 0 : i32
    %c0_i32_0 = arith.constant 0 : i32
    %c0_i32_1 = arith.constant 0 : i32
    return %c0_i32, %c0_i32_0 : i32, i32
  }
  func.func @transform_4(%arg0: i32) -> (i32, i32) {
    %c0_i32 = arith.constant 0 : i32
    %c0_i32_0 = arith.constant 0 : i32
    %c0_i32_1 = arith.constant 0 : i32
    return %c0_i32, %c0_i32_0 : i32, i32
  }
  func.func @transform_5(%arg0: i32) -> (i32, i32) {
    %c0_i32 = arith.constant 0 : i32
    %c0_i32_0 = arith.constant 0 : i32
    %c0_i32_1 = arith.constant 0 : i32
    return %c0_i32, %c0_i32_0 : i32, i32
  }
  func.func @transform_6(%arg0: i32) -> (i32, i32) {
    %c0_i32 = arith.constant 0 : i32
    %c0_i32_0 = arith.constant 0 : i32
    %c0_i32_1 = arith.constant 0 : i32
    return %c0_i32, %c0_i32_0 : i32, i32
  }
  func.func @transform_7(%arg0: i32) -> (i32, i32) {
    %c0_i32 = arith.constant 0 : i32
    %c0_i32_0 = arith.constant 0 : i32
    %c0_i32_1 = arith.constant 0 : i32
    return %c0_i32, %c0_i32_0 : i32, i32
  }
  func.func @transform_8(%arg0: i32) -> (i32, i32, i32) {
    %c0_i32 = arith.constant 0 : i32
    %c0_i32_0 = arith.constant 0 : i32
    %c0_i32_1 = arith.constant 0 : i32
    return %arg0, %c0_i32, %c0_i32_0 : i32, i32, i32
  }
}

</mosaic_0001>

<bundles_post_ra>
// kernel: last2d_forward.1
= control target key start
LH: loop header
LB: loop body
LE: loop exit
PB: predicated region body
PF: predicated region fallthrough
CT: control target
= control target key end

     0   :  { %s943_s27 = smov 0   ;;  %s1235_s0 = inlined_call_operand.vmem [shape: f32[2,8,256], index: 0, kind: input, shape index: {}]   ;;  %s1236_s1 = inlined_call_operand.vmem [shape: f32[8,72], index: 1, kind: input, shape index: {}]   ;;  %s1237_s2 = inlined_call_operand.vmem [shape: f32[8,256], index: 2, kind: input, shape index: {}]   ;;  %s1238_s3 = inlined_call_operand.vmem [shape: f32[8,72], index: 3, kind: input, shape index: {}]   ;;  %s1239_s4 = inlined_call_operand.vmem [shape: f32[8,256], index: 4, kind: input, shape index: {}]   ;;  %s1240_s5 = inlined_call_operand.vmem [shape: f32[3,8], index: 5, kind: input, shape index: {}]   ;;  %s1241_s6 = inlined_call_operand.vmem [shape: f32[3,256], index: 6, kind: input, shape index: {}]   ;;  %s1242_s7 = inlined_call_operand.vmem [shape: f32[9,256], index: 7, kind: input, shape index: {}]   ;;  %s1243_s8 = inlined_call_operand.vmem [shape: f32[2,3,256], index: 8, kind: output, shape index: {}]  }
   0x1 LB: > { %s813_s28 = sadd.s32 4294967295, %s887_s27   ;;  %p817_p0 = scmp.ge.s32.totalorder %s887_s27, 1  ;;  %s887_s27 = sphi %s943_s27, %s18_s27  }
   0x2   : > { %p262_p1 = scmp.lt.s32.totalorder %s887_s27, 3 }
   0x4   : > { %p263_p2 = pnand %p817_p0, %p262_p1 }
   0x5   : > { %p296_p3 = scmp.lt.s32.totalorder (!%p263_p2), %s813_s28, 1  ;;  %s889_s11 = smov (!%p263_p2), 16   ;;  %v895_v2 = vmov (!%p263_p2), 0.0   ;;  %v324_v3 = vlaneseq (!%p263_p2)  ;;  %v1004_v8 = vld [vmem:[%s1242_s7] sm:$0xff] (!%p263_p2)  ;;  %v1009_v9 = vld [vmem:[%s1242_s7 + $0x8] sm:$0xff] (!%p263_p2)  ;;  %vm458_vm8 = vcmask (!%p263_p2), 588800  }
   0x6   : > { %266 = sbr.rel (%p263_p2) target bundleno = 971 (0x3cb), region = 52  ;;  %s890_s12 = smov (!%p263_p2), 17   ;;  %526 = vmatprep.mubr.f32.mxu0 (!%p263_p2), %v895_v2  ;;  %666 = vmatprep.mubr.f32.mxu1 (!%p263_p2), %v895_v2  ;;  %vm678_vm9 = vcmask (!%p263_p2), 64512  }
   0x7   : > { %s891_s13 = smov (!%p263_p2), 15   ;;  %s892_s14 = smov (!%p263_p2), 1   ;;  %v995_v4 = vshrl.u32 (!%p263_p2), %v324_v3, 7  ;;  %v997_v5 = vand.u32 (!%p263_p2), 127, %v324_v3 }
   0x8   : > { %s893_s15 = smov (!%p263_p2), 127   ;;  %s894_s16 = smov (!%p263_p2), 113  }
   0x9   : > { %s896_s17 = smov (!%p263_p2), 112   ;;  %s897_s18 = smov (!%p263_p2), 111   ;;  %v348_v6 = vsub.s32 (!%p263_p2), 1, %v995_v4  ;;  %v331_v7 = vsub.s32 (!%p263_p2), 0, %v995_v4  ;;  %vm343_vm0 = vcmp.lt.s32.totalorder (!%p263_p2), %v997_v5, 16  ;;  %vm326_vm1 = vcmp.lt.s32.totalorder (!%p263_p2), %v997_v5, 17 }
   0xa   : > { %v365_v18 = vsub.s32 (!%p263_p2), 2, %v995_v4  ;;  %v382_v19 = vsub.s32 (!%p263_p2), 3, %v995_v4  ;;  %vm360_vm2 = vcmp.lt.s32.totalorder (!%p263_p2), %v997_v5, 15  ;;  %vm377_vm3 = vcmp.lt.s32.totalorder (!%p263_p2), %v997_v5, 1 }
   0xb   : > { %v1014_v12 = vrot.slane (!%p263_p2), %v1004_v8, %v348_v6  ;;  %v1017_v13 = vrot.slane (!%p263_p2), %v1004_v8, %v331_v7  ;;  %v1020_v14 = vrot.slane (!%p263_p2), %v1009_v9, %v331_v7  ;;  %v1023_v15 = vrot.slane (!%p263_p2), %v1009_v9, %v348_v6 }
   0xc   : > { %v399_v32 = vsub.s32 (!%p263_p2), 5, %v995_v4  ;;  %v1043_v33 = vrot.slane (!%p263_p2), %v1004_v8, %v365_v18  ;;  %v1046_v34 = vrot.slane (!%p263_p2), %v1009_v9, %v365_v18  ;;  %v1049_v35 = vrot.slane (!%p263_p2), %v1004_v8, %v382_v19 }
   0xd   : > { %s1245_s28 = smov (!%p296_p3, %s813_s28), 1  ;;  %v1052_v36 = vrot.slane %v1009_v9, %v382_v19  ;;  %vm394_vm4 = vcmp.lt.s32.totalorder %v997_v5, 127  ;;  %v416_v55 = vsub.s32 6, %v995_v4  ;;  %v433_v58 = vsub.s32 7, %v995_v4  ;;  %v1113_v19 = vld [vmem:[%s1242_s7 + $0x18] ss:$0 sm:$0xff] }
   0xe   : > { %s829_s29 = sshll.u32 %s1245_s28, 4  ;;  %v1064_v43 = vrot.slane %v1004_v8, %v399_v32  ;;  %v1067_v44 = vrot.slane %v1009_v9, %v399_v32  ;;  %vm411_vm5 = vcmp.lt.s32.totalorder %v997_v5, 113  ;;  %vm428_vm6 = vcmp.lt.s32.totalorder %v997_v5, 112  ;;  %s830_s23 = sshll.u32 %s1245_s28, 3 }
   0xf   : > { %s300_s10 = scalar_lea.vmem %s1235_s0, %s829_s29  ;;  %v1085_v63 = vrot.slane %v1004_v8, %v416_v55  ;;  %v1088_v3 = vrot.slane %v1009_v9, %v416_v55  ;;  %v1092_v4 = vrot.slane %v1004_v8, %v433_v58  ;;  %v1095_v6 = vrot.slane %v1009_v9, %v433_v58  ;;  %s305_s26 = scalar_lea.vmem %s1243_s8, %s830_s23 }
  0x10   : > { %v957_v0 = vld [vmem:[%s300_s10] sm:$0xff]  ;;  %v963_v1 = vld [vmem:[%s300_s10 + $0x8] sm:$0xff]  ;;  %vm445_vm7 = vcmp.lt.s32.totalorder %v997_v5, 111 }
  0x11   : > { %339 = vrot.lane.b32.xlu1 %v957_v0, %s889_s11  ;;  %320 = vrot.lane.b32.xlu0 %v957_v0, %s890_s12  ;;  %v317_v5 = vld [vmem:[%s1239_s4 + $0x8] sm:$0xff] }
  0x15   : > { %341 = vrot.lane.b32.xlu1 %v963_v1, %s889_s11  ;;  %322 = vrot.lane.b32.xlu0 %v963_v1, %s890_s12 }
  0x19   : > { %358 = vrot.lane.b32.xlu1 %v963_v1, %s891_s13  ;;  %356 = vrot.lane.b32.xlu0 %v957_v0, %s891_s13 }
  0x1d   : > { %375 = vrot.lane.b32.xlu1 %v963_v1, %s892_s14  ;;  %373 = vrot.lane.b32.xlu0 %v957_v0, %s892_s14 }
  0x21   : > { %392 = vrot.lane.b32.xlu1 %v963_v1, %s893_s15  ;;  %390 = vrot.lane.b32.xlu0 %v957_v0, %s893_s15 }
  0x25   : > { %409 = vrot.lane.b32.xlu1 %v963_v1, %s894_s16  ;;  %407 = vrot.lane.b32.xlu0 %v957_v0, %s894_s16 }
  0x29   : > { %426 = vrot.lane.b32.xlu1 %v963_v1, %s896_s17  ;;  %424 = vrot.lane.b32.xlu0 %v957_v0, %s896_s17 }
  0x2d   : > { %443 = vrot.lane.b32.xlu1 %v963_v1, %s897_s18  ;;  %441 = vrot.lane.b32.xlu0 %v957_v0, %s897_s18 }
  0x83   : > { %v340_v10 = vpop.permute.xlu1 %339  ;;  %v321_v11 = vpop.permute.xlu0 %320 }
  0x87   : > { %v342_v16 = vpop.permute.xlu1 %341  ;;  %v323_v17 = vpop.permute.xlu0 %322 }
  0x88   : > { %v344_v20 = vsel %vm343_vm0, %v340_v10, %v342_v16  ;;  %v345_v21 = vsel %vm343_vm0, %v342_v16, %v340_v10  ;;  %v327_v22 = vsel %vm326_vm1, %v321_v11, %v323_v17  ;;  %v328_v23 = vsel %vm326_vm1, %v323_v17, %v321_v11 }
  0x89   : > { %v354_v24 = vmul.f32 %v1014_v12, %v345_v21  ;;  %v337_v25 = vmul.f32 %v1017_v13, %v328_v23  ;;  %v338_v26 = vmul.f32 %v1020_v14, %v327_v22  ;;  %v355_v27 = vmul.f32 %v1023_v15, %v344_v20  ;;  %v1118_v22 = vld [vmem:[%s1242_s7 + $0x10] ss:$0 sm:$0xff] }
  0x8b   : > { %v359_v28 = vpop.permute.xlu1 %358  ;;  %v357_v29 = vpop.permute.xlu0 %356  ;;  %v831_v30 = vpack.c.bf16 %v355_v27, %v338_v26  ;;  %v833_v31 = vpack.c.bf16 %v354_v24, %v337_v25 }
  0x8c   : > { %v361_v37 = vsel %vm360_vm2, %v357_v29, %v359_v28  ;;  %v362_v38 = vsel %vm360_vm2, %v359_v28, %v357_v29  ;;  %v312_v29 = vld [vmem:[%s1236_s1] sm:$0xff] }
  0x8d   : > { %832 = vmatprep.subr.bf16.mxu0 %v831_v30  ;;  %v371_v45 = vmul.f32 %v1043_v33, %v362_v38  ;;  %v372_v46 = vmul.f32 %v1046_v34, %v361_v37  ;;  %v313_v30 = vld [vmem:[%s1237_s2] sm:$0xff] }
  0x8e   : > { %834 = vmatpush1.bf16.msra.mxu0 %v833_v31  ;;  %v314_v31 = vld [vmem:[%s1237_s2 + $0x8] sm:$0xff] }
  0x8f   : > { %v376_v39 = vpop.permute.xlu1 %375  ;;  %v374_v40 = vpop.permute.xlu0 %373 }
  0x90   : > { %v378_v41 = vsel %vm377_vm3, %v374_v40, %v376_v39  ;;  %v379_v42 = vsel %vm377_vm3, %v376_v39, %v374_v40 }
  0x91   : > { %v388_v47 = vmul.f32 %v1049_v35, %v379_v42  ;;  %v389_v48 = vmul.f32 %v1052_v36, %v378_v41 }
  0x93   : > { %v393_v49 = vpop.permute.xlu1 %392  ;;  %v391_v50 = vpop.permute.xlu0 %390  ;;  %v835_v51 = vpack.c.bf16 %v389_v48, %v372_v46  ;;  %v837_v52 = vpack.c.bf16 %v388_v47, %v371_v45 }
  0x94   : > { %v395_v53 = vsel %vm394_vm4, %v391_v50, %v393_v49  ;;  %v396_v54 = vsel %vm394_vm4, %v393_v49, %v391_v50 }
  0x95   : > { %v405_v56 = vmul.f32 %v1064_v43, %v395_v53  ;;  %v406_v57 = vmul.f32 %v1067_v44, %v396_v54  ;;  %836 = vmatprep.subr.bf16.mxu0 %v835_v51 }
  0x96   : > { %838 = vmatpush1.bf16.msra.mxu0 %v837_v52 }
  0x97   : > { %v410_v59 = vpop.permute.xlu1 %409  ;;  %v408_v60 = vpop.permute.xlu0 %407  ;;  %v839_v61 = vpack.c.bf16 %v406_v57, %v963_v1  ;;  %v841_v62 = vpack.c.bf16 %v405_v56, %v957_v0 }
  0x98   : > { %v412_v1 = vsel %vm411_vm5, %v408_v60, %v410_v59  ;;  %v413_v0 = vsel %vm411_vm5, %v410_v59, %v408_v60 }
  0x99   : > { %840 = vmatprep.subr.bf16.mxu0 %v839_v61  ;;  %v422_v8 = vmul.f32 %v1085_v63, %v412_v1  ;;  %v423_v9 = vmul.f32 %v1088_v3, %v413_v0 }
  0x9a   : > { %842 = vmatpush1.bf16.msra.mxu0 %v841_v62 }
  0x9b   : > { %v427_v7 = vpop.permute.xlu1 %426  ;;  %v425_v10 = vpop.permute.xlu0 %424 }
  0x9c   : > { %v429_v11 = vsel %vm428_vm6, %v425_v10, %v427_v7  ;;  %v430_v16 = vsel %vm428_vm6, %v427_v7, %v425_v10 }
  0x9d   : > { %v439_v17 = vmul.f32 %v1092_v4, %v429_v11  ;;  %v440_v18 = vmul.f32 %v1095_v6, %v430_v16 }
  0x9f   : > { %v444_v20 = vpop.permute.xlu1 %443  ;;  %v843_v21 = vpack.c.bf16 %v440_v18, %v423_v9  ;;  %v442_v23 = vpop.permute.xlu0 %441  ;;  %v845_v24 = vpack.c.bf16 %v439_v17, %v422_v8 }
  0xa0   : > { %v446_v25 = vsel %vm445_vm7, %v442_v23, %v444_v20  ;;  %v447_v26 = vsel %vm445_vm7, %v444_v20, %v442_v23 }
  0xa1   : > { %844 = vmatprep.subr.bf16.mxu0 %v843_v21  ;;  %v457_v27 = vmul.f32 %v1113_v19, %v447_v26  ;;  %v456_v28 = vmul.f32 %v1118_v22, %v446_v25 }
  0xa2   : > { %846 = vmatpush1.bf16.msra.mxu0 %v845_v24 }
  0xa3   : > { %478 = vmatprep.subr.mxu0 %v457_v27 }
  0xa6   : > { %479 = vmatpush1.msra.mxu0 %v456_v28 }
  0xa7   : > { %824 = vmatmul.mubr.msk.f32.vlgmr.msra.gmra.mrb[0].mxu0 %vm458_vm8, %v312_v29 }
  0xa8   : > { %746 = vmatprep.mubr.f32.mxu0 %v895_v2 }
 0x17a   : > { %v528_v32 = vpop.f32.mrb[0].mxu0 }
 0x17b   : > { %v529_v37 = vadd.f32 %v528_v32, %v313_v30  ;;  %v530_v38 = vpop.f32.mrb[1].mxu0 }
 0x17c   : > { %v531_v39 = vadd.f32 %v530_v38, %v314_v31 }
 0x17d   : > { %v1137_v40 = vmax.f32 %v529_v37, 0.0 }
 0x17e   : > { %v534_v41 = vmax.f32 %v531_v39, 0.0 }
 0x17f   : > { %535 = vrot.lane.b32.xlu0 %v1137_v40, %s890_s12 }
 0x180   : > { %537 = vrot.lane.b32.xlu1 %v534_v41, %s890_s12 }
 0x183   : > { %543 = vrot.lane.b32.xlu0 %v1137_v40, %s889_s11 }
 0x184   : > { %545 = vrot.lane.b32.xlu1 %v534_v41, %s889_s11 }
 0x187   : > { %551 = vrot.lane.b32.xlu0 %v1137_v40, %s891_s13 }
 0x188   : > { %553 = vrot.lane.b32.xlu1 %v534_v41, %s891_s13 }
 0x18b   : > { %559 = vrot.lane.b32.xlu0 %v1137_v40, %s892_s14 }
 0x18c   : > { %561 = vrot.lane.b32.xlu1 %v534_v41, %s892_s14 }
 0x18f   : > { %567 = vrot.lane.b32.xlu0 %v1137_v40, %s893_s15 }
 0x190   : > { %569 = vrot.lane.b32.xlu1 %v534_v41, %s893_s15 }
 0x193   : > { %575 = vrot.lane.b32.xlu0 %v1137_v40, %s894_s16 }
 0x194   : > { %577 = vrot.lane.b32.xlu1 %v534_v41, %s894_s16 }
 0x197   : > { %583 = vrot.lane.b32.xlu0 %v1137_v40, %s896_s17 }
 0x198   : > { %585 = vrot.lane.b32.xlu1 %v534_v41, %s896_s17 }
 0x19b   : > { %591 = vrot.lane.b32.xlu0 %v1137_v40, %s897_s18 }
 0x19c   : > { %593 = vrot.lane.b32.xlu1 %v534_v41, %s897_s18 }
 0x1f1   : > { %v536_v2 = vpop.permute.xlu0 %535 }
 0x1f2   : > { %v538_v42 = vpop.permute.xlu1 %537 }
 0x1f3   : > { %v539_v45 = vsel %vm326_vm1, %v536_v2, %v538_v42  ;;  %v540_v46 = vsel %vm326_vm1, %v538_v42, %v536_v2  ;;  %v318_v42 = vld [vmem:[%s1240_s5] sm:$0x7] }
 0x1f4   : > { %v541_v51 = vmul.f32 %v540_v46, %v1017_v13  ;;  %v542_v53 = vmul.f32 %v539_v45, %v1020_v14  ;;  %v319_v45 = vld [vmem:[%s1241_s6] sm:$0x77] }
 0x1f5   : > { %v544_v47 = vpop.permute.xlu0 %543  ;;  %v676_v46 = vcombine.high %v319_v45, %v319_v45 }
 0x1f6   : > { %v546_v48 = vpop.permute.xlu1 %545 }
 0x1f7   : > { %v547_v49 = vsel %vm343_vm0, %v544_v47, %v546_v48  ;;  %v548_v50 = vsel %vm343_vm0, %v546_v48, %v544_v47 }
 0x1f8   : > { %v549_v52 = vmul.f32 %v548_v50, %v1014_v12  ;;  %v550_v54 = vmul.f32 %v547_v49, %v1023_v15 }
 0x1f9   : > { %v552_v55 = vpop.permute.xlu0 %551 }
 0x1fa   : > { %v554_v56 = vpop.permute.xlu1 %553  ;;  %v847_v57 = vpack.c.bf16 %v550_v54, %v542_v53  ;;  %v849_v58 = vpack.c.bf16 %v549_v52, %v541_v51 }
 0x1fb   : > { %v555_v59 = vsel %vm360_vm2, %v552_v55, %v554_v56  ;;  %v556_v60 = vsel %vm360_vm2, %v554_v56, %v552_v55 }
 0x1fc   : > { %848 = vmatprep.subr.bf16.mxu1 %v847_v57  ;;  %v557_v15 = vmul.f32 %v556_v60, %v1043_v33  ;;  %v558_v62 = vmul.f32 %v555_v59, %v1046_v34 }
 0x1fd   : > { %850 = vmatpush1.bf16.msra.mxu1 %v849_v58  ;;  %v560_v61 = vpop.permute.xlu0 %559 }
 0x1fe   : > { %v562_v13 = vpop.permute.xlu1 %561 }
 0x1ff   : > { %v563_v12 = vsel %vm377_vm3, %v560_v61, %v562_v13  ;;  %v564_v14 = vsel %vm377_vm3, %v562_v13, %v560_v61 }
 0x200   : > { %v565_v1 = vmul.f32 %v564_v14, %v1049_v35  ;;  %v566_v0 = vmul.f32 %v563_v12, %v1052_v36 }
 0x201   : > { %v568_v7 = vpop.permute.xlu0 %567 }
 0x202   : > { %v570_v10 = vpop.permute.xlu1 %569  ;;  %v851_v11 = vpack.c.bf16 %v566_v0, %v558_v62  ;;  %v853_v16 = vpack.c.bf16 %v565_v1, %v557_v15 }
 0x203   : > { %v571_v8 = vsel %vm394_vm4, %v568_v7, %v570_v10  ;;  %v572_v9 = vsel %vm394_vm4, %v570_v10, %v568_v7 }
 0x204   : > { %v573_v17 = vmul.f32 %v571_v8, %v1064_v43  ;;  %v574_v33 = vmul.f32 %v572_v9, %v1067_v44  ;;  %852 = vmatprep.subr.bf16.mxu1 %v851_v11 }
 0x205   : > { %854 = vmatpush1.bf16.msra.mxu1 %v853_v16  ;;  %v576_v34 = vpop.permute.xlu0 %575 }
 0x206   : > { %v578_v35 = vpop.permute.xlu1 %577  ;;  %v855_v18 = vpack.c.bf16 %v574_v33, %v534_v41  ;;  %v857_v36 = vpack.c.bf16 %v573_v17, %v1137_v40 }
 0x207   : > { %v579_v20 = vsel %vm411_vm5, %v576_v34, %v578_v35  ;;  %v580_v21 = vsel %vm411_vm5, %v578_v35, %v576_v34 }
 0x208   : > { %856 = vmatprep.subr.bf16.mxu1 %v855_v18  ;;  %v581_v25 = vmul.f32 %v579_v20, %v1085_v63  ;;  %v582_v26 = vmul.f32 %v580_v21, %v1088_v3  ;;  %v315_v3 = vld [vmem:[%s1238_s3] sm:$0xff] }
 0x209   : > { %858 = vmatpush1.bf16.msra.mxu1 %v857_v36  ;;  %v584_v23 = vpop.permute.xlu0 %583 }
 0x20a   : > { %v586_v24 = vpop.permute.xlu1 %585 }
 0x20b   : > { %v587_v43 = vsel %vm428_vm6, %v584_v23, %v586_v24  ;;  %v588_v44 = vsel %vm428_vm6, %v586_v24, %v584_v23 }
 0x20c   : > { %v589_v27 = vmul.f32 %v587_v43, %v1092_v4  ;;  %v590_v28 = vmul.f32 %v588_v44, %v1095_v6  ;;  %v316_v4 = vld [vmem:[%s1239_s4] sm:$0xff] }
 0x20d   : > { %v592_v29 = vpop.permute.xlu0 %591 }
 0x20e   : > { %v594_v30 = vpop.permute.xlu1 %593  ;;  %v859_v31 = vpack.c.bf16 %v590_v28, %v582_v26  ;;  %v861_v32 = vpack.c.bf16 %v589_v27, %v581_v25 }
 0x20f   : > { %v596_v37 = vsel %vm445_vm7, %v594_v30, %v592_v29  ;;  %v595_v38 = vsel %vm445_vm7, %v592_v29, %v594_v30 }
 0x210   : > { %v598_v39 = vmul.f32 %v1113_v19, %v596_v37  ;;  %860 = vmatprep.subr.bf16.mxu1 %v859_v31  ;;  %v597_v63 = vmul.f32 %v1118_v22, %v595_v38 }
 0x211   : > { %862 = vmatpush1.bf16.msra.mxu1 %v861_v32 }
 0x212   : > { %618 = vmatprep.subr.mxu1 %v598_v39 }
 0x215   : > { %619 = vmatpush1.msra.mxu1 %v597_v63 }
 0x216   : > { %825 = vmatmul.mubr.msk.f32.vlgmr.msra.gmra.mrb[0].mxu1 %vm458_vm8, %v315_v3 }
 0x2e9   : > { %v668_v6 = vpop.f32.mrb[0].mxu1 }
 0x2ea   : > { %v669_v19 = vadd.f32 %v668_v6, %v316_v4  ;;  %v670_v40 = vpop.f32.mrb[1].mxu1 }
 0x2eb   : > { %v671_v22 = vadd.f32 %v670_v40, %v317_v5 }
 0x2ec   : > { %v673_v2 = vmax.f32 %v669_v19, 0.0 }
 0x2ed   : > { %v674_v41 = vmax.f32 %v671_v22, 0.0 }
 0x2ef   : > { %682 = vmatprep.subr.mxu0 %v674_v41 }
 0x2f0   : > { %683 = vmatpush1.msra.mxu0 %v673_v2 }
 0x2f1   : > { %826 = vmatmul.mubr.msk.f32.vlgmr.msra.gmra.mrb[2].mxu0 %vm678_vm9, %v318_v42 }
 0x3c4   : > { %v748_v47 = vpop.f32.mrb[2].mxu0 }
 0x3c5   : > { %v749_v48 = vadd.f32 %v748_v47, %v319_v45  ;;  %v750_v49 = vpop.f32.mrb[3].mxu0 }
 0x3c6   : > { %v751_v50 = vadd.f32 %v750_v49, %v676_v46 }
 0x3c8   : > { %v755_v51 = vcombine.low %v749_v48, %v751_v50 }
 0x3ca   : > { %757 = vst [vmem:[%s305_s26] sm:$0x77] %v755_v51 }
 0x3cb PF: > { %s18_s27 = sadd.s32 1, %s887_s27  }
 0x3cc   : > { %p15_p4 = scmp.ge.s32.totalorder %s18_s27, 4  }
 0x3ce   :  { %17 = sbr.rel (!%p15_p4) target bundleno = 1 (0x1), region = 82 }

</bundles_post_ra>
